<compile_context>
chip_gen: v7x
topology: tpu7x:2x2x1
jax: 0.10.0
libtpu: 0.0.40
codegen_flags: <defaults>
</compile_context>

<pallas_src>
import jax
import jax.numpy as jnp
from jax.experimental import pallas as pl
from jax.experimental.pallas import tpu as pltpu


def _pooler_kernel(cls_ref, w_ref, b_ref, o_ref):
    # cls_ref: [B, H] f32, w_ref: [H_in, H_out] bf16, b_ref: [1, H] f32.
    # bf16 MXU matmul with f32 accumulation; epilogue (bias + tanh) stays f32.
    y = jnp.dot(
        cls_ref[...].astype(jnp.bfloat16),
        w_ref[...],
        preferred_element_type=jnp.float32,
    ) + b_ref[...]
    o_ref[...] = jnp.tanh(y)  # EUP slot


def bert_pooler(hidden_states, weight, bias):
    """Pallas BERT pooler: tanh(hidden_states[:, 0, :] @ weight.T + bias).

    Args:
      hidden_states: [B, S, H] float32 activations.
      weight: [H, H] in PyTorch nn.Linear layout, i.e. [out_features, in_features].
      bias:   [H] PyTorch nn.Linear bias.

    Returns:
      [B, H] float32.
    """
    B, S, H = hidden_states.shape
    assert weight.shape == (H, H), "weight must be [out_features, in_features]"
    assert bias.shape == (H,), "bias must be [out_features]"

    # CLS selection at the call boundary: only B*H activation bytes reach the
    # kernel; the other S-1 rows never leave HBM.
    cls = hidden_states[:, 0, :]                       # [B, H] f32

    # PyTorch layout [out, in] -> [in, out] so the kernel computes x @ W_io + b
    # (== x @ weight.T + bias).  Cast once to bf16 to halve the weight DMA.
    w_io = weight.T.astype(jnp.bfloat16)               # [H_in, H_out]
    b_row = bias.reshape(1, H).astype(jnp.float32)     # [1, H]

    return pl.pallas_call(
        _pooler_kernel,
        out_shape=jax.ShapeDtypeStruct((B, H), jnp.float32),
        # No grid: single invocation, whole (tiny) operands resident in VMEM,
        # no pipeline prologue, no unused double-buffers.
        in_specs=[
            pl.BlockSpec(memory_space=pltpu.MemorySpace.VMEM),  # CLS activations
            pl.BlockSpec(memory_space=pltpu.MemorySpace.VMEM),  # weight [in, out] bf16
            pl.BlockSpec(memory_space=pltpu.MemorySpace.VMEM),  # bias [1, H]
        ],
        out_specs=pl.BlockSpec(memory_space=pltpu.MemorySpace.VMEM),
    )(cls, w_io, b_row)


if __name__ == "__main__":
    # Small shapes consistent with the module: batch=2, seq=8, hidden=32.
    # (At these shapes the kernel is pure launch overhead; feeding many more CLS
    # rows per call amortizes the launch + weight DMA essentially for free.)
    B, S, H = 2, 8, 32

    key = jax.random.PRNGKey(0)
    kh, kw, kb = jax.random.split(key, 3)
    hidden_states = jax.random.normal(kh, (B, S, H), dtype=jnp.float32)
    # PyTorch nn.Linear layout: weight [out_features, in_features], bias [out_features].
    weight = (0.02 * jax.random.normal(kw, (H, H))).astype(jnp.float32)
    bias = (0.02 * jax.random.normal(kb, (H,))).astype(jnp.float32)

    pooler = jax.jit(bert_pooler)
    out = jax.block_until_ready(pooler(hidden_states, weight, bias))

    # PyTorch-equivalent pure-JAX reference (f32 end to end).
    ref = jnp.tanh(hidden_states[:, 0, :] @ weight.T + bias)

    assert out.shape == (B, H) and out.dtype == jnp.float32
    # bf16 matmul operands with f32 accumulation -> loosened tolerance vs f32 ref.
    assert jnp.allclose(out, ref, atol=1e-2, rtol=1e-2), "mismatch vs reference"
    print("KERNEL_OK")
</pallas_src>

<mosaic_0001>
module attributes {stable_mosaic.version = 11 : i64} {
  func.func @_pooler_kernel(%arg0: memref<2x32xf32, #tpu.memory_space<vmem>>, %arg1: memref<32x32xbf16, #tpu.memory_space<vmem>>, %arg2: memref<1x32xf32, #tpu.memory_space<vmem>>, %arg3: memref<2x32xf32, #tpu.memory_space<vmem>>) attributes {dimension_semantics = [], scalar_prefetch = 0 : i64, scratch_operands = 0 : i64, tpu.core_type = #tpu.core_type<tc>} {
    %c0 = arith.constant 0 : index
    %c0_0 = arith.constant 0 : index
    %0 = vector.load %arg0[%c0, %c0_0] : memref<2x32xf32, #tpu.memory_space<vmem>>, vector<2x32xf32>
    %1 = arith.truncf %0 : vector<2x32xf32> to vector<2x32xbf16>
    %c0_1 = arith.constant 0 : index
    %c0_2 = arith.constant 0 : index
    %2 = vector.load %arg1[%c0_1, %c0_2] : memref<32x32xbf16, #tpu.memory_space<vmem>>, vector<32x32xbf16>
    %cst = arith.constant dense<0.000000e+00> : vector<2x32xf32>
    %3 = tpu.matmul %1, %2, %cst {dimension_numbers = #tpu.dot_dimension_numbers<[1], [0], [0], [1], [0, 0, 1, 1], [], []>} : vector<2x32xbf16>, vector<32x32xbf16>, vector<2x32xf32> -> vector<2x32xf32>
    %c0_3 = arith.constant 0 : index
    %c0_4 = arith.constant 0 : index
    %4 = vector.load %arg2[%c0_3, %c0_4] : memref<1x32xf32, #tpu.memory_space<vmem>>, vector<1x32xf32>
    %5 = vector.broadcast %4 : vector<1x32xf32> to vector<2x32xf32>
    %6 = arith.addf %3, %5 : vector<2x32xf32>
    %7 = math.tanh %6 : vector<2x32xf32>
    %c0_5 = arith.constant 0 : index
    %c0_6 = arith.constant 0 : index
    %8 = vector.load %arg3[%c0_5, %c0_6] : memref<2x32xf32, #tpu.memory_space<vmem>>, vector<2x32xf32>
    tpu.vector_store %arg3[%c0_5, %c0_6], %7 {strides = array<i32>} : memref<2x32xf32, #tpu.memory_space<vmem>>, vector<2x32xf32>,
    return
  }
}

</mosaic_0001>

<bundles_post_ra>
// kernel: bert_pooler.1
= control target key start
LH: loop header
LB: loop body
LE: loop exit
PB: predicated region body
PF: predicated region fallthrough
CT: control target
= control target key end

     0   :  { %v148_v1 = vmov 0.0   ;;  %vm149_vm0 = vmmov 0   ;;  %s195_s0 = inlined_call_operand.vmem [shape: f32[2,32], index: 0, kind: input, shape index: {}]   ;;  %s196_s1 = inlined_call_operand.vmem [shape: bf16[32,32], index: 1, kind: input, shape index: {}]   ;;  %s197_s2 = inlined_call_operand.vmem [shape: f32[1,32], index: 2, kind: input, shape index: {}]   ;;  %s198_s3 = inlined_call_operand.hbm [shape: f32[2,32], index: 3, kind: output, shape index: {}]  }
   0x1   :  { %v120_v0 = vld [vmem:[%s196_s1] sm:$0xff]   ;;  %109 = vmatprep.subr.bf16.mxu0 %v148_v1  ;;  %v121_v2 = vld [vmem:[%s196_s1 + $0x8] sm:$0xff]   ;;  %113 = vmatprep.mubr.msk.bf16.mxu0 %vm149_vm0, %v148_v1 }
   0x2   :  { %110 = vmatpush3.bf16.msra.mxu0 %v120_v0  ;;  %v16_v3 = vld [vmem:[%s195_s0] sm:$0x3] }
   0x3   :  { %111 = vmatprep.subr.bf16.mxu0 %v148_v1 }
   0x4   :  { %8 = vsyncpa [#allocation3], 0  ;;  %v17_v4 = vpack.c.bf16 %v16_v3, %v16_v3  ;;  %vm41_vm1 = vcmask 261120   ;;  %v102_v5 = vld [vmem:[%s197_s2] ss:$0 sm:$0xff]  ;;  %s150_s1 = smov [#allocation2]  }
   0x5   :  { %s94_s20 = sshll.u32 %s150_s1, 4  ;;  %vm86_vm2 = vcmask 254976   ;;  %s95_s20 = int_to_ptr.vmem [resolvable:$true] %s94_s20 }
   0x6   :  { %112 = vmatpush3.bf16.msra.mxu0 %v121_v2  ;;  %s124_s0 = scalar_lea.vmem %s95_s20, 32  ;;  %p129_p1 = scmp.lt.s32.totalorder %s95_s20, %s95_s20 }
   0x7   :  { %p125_p0 = scmp.ne.s32.totalorder %s95_s20, %s124_s0  ;;  %p130_p2 = scmp.lt.s32.totalorder %s124_s0, %s124_s0 }
   0x9   :  { %114 = vmatmul.mubr.msk.bf16.vlgmr.msra.gmra.mrb[0].mxu0 %vm41_vm1, %v17_v4  ;;  %p131_p3 = por %p130_p2, %p129_p1 }
   0xb   :  { %p132_p4 = pnand %p131_p3, %p125_p0 }
  0xdc   :  { %v79_v6 = vpop.f32.mrb[0].mxu0 }
  0xdd   :  { %v80_v7 = vadd.f32 %v102_v5, %v79_v6  ;;  %v115_v8 = vpop.f32.mrb[1].mxu0 }
  0xde   :  { %v82_v9 = vpop.f32.mrb[2].mxu0 }
  0xdf   :  { %122 = vtanh.f32 %v80_v7  ;;  %v116_v10 = vpop.f32.mrb[3].mxu0 }
  0xe9   :  { %v123_v11 = vpop.eup %122 }
  0xea   :  { %87 = vst.msk [vmem:[#allocation2] sm:$0x3] %vm86_vm2, %v123_v11 }
  0xeb   :  { %135 = shalt.err (!%p132_p4)
}
  0xec   :  { %s136_s22 = scalar_lea.hbm %s198_s3, 32 }
  0xed   :  { %p137_p5 = scmp.ne.s32.totalorder %s198_s3, %s136_s22  ;;  %p140_p6 = scmp.lt.u32.totalorder %s136_s22, %s198_s3 }
  0xef   :  { %p142_p7 = pnand %p140_p6, %p137_p5 }
  0xf1   :  { %145 = shalt.err (!%p142_p7)
}
  0xf2   :  { %97 = dma.vmem_to_hbm [thread:$0]  %s95_s20, 32, %s198_s3, [#allocation3]  }
  0xf3   :  { %146 = dma.done.wait [#allocation3], 32  }
  0xf4   :  { %147 = vsyncadd [#allocation3], 4294967264 }
  0xf5   :  { %101 = vsyncpa [#allocation3], 1 }

</bundles_post_ra>
